<compile_context>
chip_gen: v7x
topology: tpu7x:2x2x1
jax: 0.10.0
libtpu: 0.0.40
codegen_flags: <defaults>
</compile_context>

<pallas_src>
import functools
import math

import jax
import jax.numpy as jnp
from jax import lax
from jax.experimental import pallas as pl
from jax.experimental.pallas import tpu as pltpu

MASK_SCALE = -1000000000000000.0  # same additive constant as the PyTorch module


@functools.lru_cache(maxsize=None)
def _vmem_limit_bytes():
    """Generation-aware scoped-VMEM budget (v7x: 64 MiB/TC, v5e/v6e: 128 MiB)."""
    cap = None
    try:
        cap = getattr(pltpu.get_tpu_info(), "vmem_capacity_bytes", None)
    except Exception:
        cap = None
    if cap is None or cap <= 0:
        return 40 * 1024 * 1024          # conservative default, fits v7x
    if cap <= 80 * 1024 * 1024:          # v7x-class part (64 MiB per TensorCore)
        return 40 * 1024 * 1024
    return 48 * 1024 * 1024              # v5e / v6e (128 MiB physical)


def _pick_tile(dim, preferred):
    """Largest power-of-two tile <= preferred that divides dim, else full dim."""
    t = preferred
    while t > 8:
        if dim % t == 0:
            return t
        t //= 2
    return dim


# ----------------------------------------------------------------------------
# Kernel 1: batched tiled linear  out[g] = x[g] @ w[g] + b[g]
#   x: (G, M, K), w: (G, K, N), b: (G, 1, N) -> out: (G, M, N)
#   bf16 MXU feeds, f32 accumulator, bias added in f32 at finalize.
# ----------------------------------------------------------------------------
def _linear_kernel(x_ref, w_ref, b_ref, o_ref, acc_ref):
    k_idx = pl.program_id(3)

    @pl.when(k_idx == 0)
    def _init():
        acc_ref[...] = jnp.zeros_like(acc_ref)

    acc_ref[...] += jnp.dot(
        x_ref[0].astype(jnp.bfloat16),
        w_ref[0].astype(jnp.bfloat16),
        preferred_element_type=jnp.float32,
    )

    @pl.when(k_idx == pl.num_programs(3) - 1)
    def _finalize():
        o_ref[0] = (acc_ref[...] + b_ref[0].astype(jnp.float32)).astype(o_ref.dtype)


def batched_linear(x, w, b, *, out_dtype=jnp.float32, tm=512, tn=256, tk=512):
    """x: (G, M, K); w: (G, K, N); b: (G, 1, N) -> (G, M, N) in `out_dtype`.

    tm defaults to 512 so the larger HBM operand (W = E x E) is re-streamed
    fewer times (v5e HBM); bf16 feeds keep the double-buffered tiles small
    enough for v7x's 64 MiB VMEM.
    """
    G, M, K = x.shape
    N = w.shape[2]
    tm = _pick_tile(M, tm)
    tn = _pick_tile(N, tn)
    tk = _pick_tile(K, tk)
    grid = (G, M // tm, N // tn, K // tk)

    return pl.pallas_call(
        _linear_kernel,
        out_shape=jax.ShapeDtypeStruct((G, M, N), out_dtype),
        grid=grid,
        in_specs=[
            pl.BlockSpec((1, tm, tk), lambda g, i, j, k: (g, i, k)),
            pl.BlockSpec((1, tk, tn), lambda g, i, j, k: (g, k, j)),
            pl.BlockSpec((1, 1, tn), lambda g, i, j, k: (g, 0, j)),
        ],
        out_specs=pl.BlockSpec((1, tm, tn), lambda g, i, j, k: (g, i, j)),
        scratch_shapes=[pltpu.VMEM((tm, tn), jnp.float32)],
        compiler_params=pltpu.CompilerParams(
            dimension_semantics=("parallel", "parallel", "parallel", "arbitrary"),
            vmem_limit_bytes=_vmem_limit_bytes(),
        ),
    )(x, w, b)


# ----------------------------------------------------------------------------
# Kernel 2: flash-style scaled-dot-product attention (online softmax).
#   q/k/v arrive head-split as (B, L, H, Dh); the kernel indexes `hb` heads per
#   grid step, unrolls them as plain 2-D MXU dots (no in-kernel transposes),
#   and writes a lane-dense (B, Lq, E) output (heads merged in the out spec).
# ----------------------------------------------------------------------------
def _flash_attention_kernel(q_ref, k_ref, v_ref, mask_ref, o_ref,
                            m_scr, l_scr, acc_scr, *, scale, hb, head_dim):
    kv = pl.program_id(3)

    @pl.when(kv == 0)
    def _init():
        m_scr[...] = jnp.full(m_scr.shape, -jnp.inf, dtype=jnp.float32)
        l_scr[...] = jnp.zeros_like(l_scr)
        acc_scr[...] = jnp.zeros_like(acc_scr)

    # Additive bias shared by every head in this block (hoisted out of the loop).
    bias = mask_ref[...].astype(jnp.float32) * MASK_SCALE          # (tq, tk)

    # Static unroll over the heads in this block; each head is a clean 2-D
    # bf16 MXU dot with f32 accumulation.
    # TODO(synk): for Dh < 128 the QK^T contraction under-fills the MXU; a
    # zero-padded 128-wide contraction would recover more MXU rate at scale.
    for h in range(hb):
        q_h = q_ref[0, :, h, :] * scale                            # (tq, Dh) bf16
        k_h = k_ref[0, :, h, :]                                    # (tk, Dh) bf16
        v_h = v_ref[0, :, h, :]                                    # (tk, Dh) bf16

        s = jnp.einsum("qd,kd->qk", q_h, k_h,
                       preferred_element_type=jnp.float32)          # (tq, tk) f32
        s = s + bias

        m_prev = m_scr[h]                                          # (tq, 1)
        m_new = jnp.maximum(m_prev, jnp.max(s, axis=-1, keepdims=True))
        alpha = jnp.exp(m_prev - m_new)
        p = jnp.exp(s - m_new)                                     # f32 stats
        l_scr[h] = alpha * l_scr[h] + jnp.sum(p, axis=-1, keepdims=True)
        acc_scr[h] = alpha * acc_scr[h] + jnp.dot(
            p.astype(v_h.dtype), v_h, preferred_element_type=jnp.float32)
        m_scr[h] = m_new

    @pl.when(kv == pl.num_programs(3) - 1)
    def _finalize():
        for h in range(hb):
            l = l_scr[h]
            inv = pl.reciprocal(l, approx=True)                    # EUP
            inv = inv * (2.0 - l * inv)                            # one Newton step
            o_ref[0, :, h * head_dim:(h + 1) * head_dim] = (
                acc_scr[h] * inv).astype(o_ref.dtype)


def _pick_h_block(H, head_dim, tq, tk, budget_bytes):
    """Heads per grid step: honors the (8,128) block-shape rule on the packed
    (B, L, H, Dh) layout and a per-step VMEM budget that counts the
    double-buffered I/O blocks, f32 acc/stats scratch and live s/p temporaries."""

    def valid(hb):
        return hb == H or (hb % 8 == 0 and (hb * head_dim) % 128 == 0)

    def step_bytes(hb):
        bf16 = 2
        q_blk = tq * hb * head_dim * bf16
        kv_blk = 2 * tk * hb * head_dim * bf16
        o_blk = tq * hb * head_dim * bf16
        mask_blk = tq * tk * 4
        dbuf = 2 * (q_blk + kv_blk + o_blk + mask_blk)     # double-buffered
        acc = hb * tq * head_dim * 4
        stats = 2 * hb * tq * 128 * 4                      # m/l, lane-padded
        live = 2 * tq * tk * 4                             # s and p in flight
        return dbuf + acc + stats + live

    cands = [d for d in range(1, H + 1) if H % d == 0 and valid(d)]
    dense = [d for d in cands if d * head_dim >= 128 and step_bytes(d) <= budget_bytes]
    if dense:
        return min(dense)                                  # lane-dense, smallest unroll
    fit = [d for d in cands if step_bytes(d) <= budget_bytes]
    if fit:
        return max(fit)
    return min(cands)


def flash_attention(q, k, v, mask, *, tq=128, tk=128, h_block=None):
    """q/k/v: (B, L, H, Dh) head-split (no transpose needed by the caller);
    mask: (Lq, Lk) additive-style (1 = disallowed), shared across batch/heads.
    Returns a lane-dense (B, Lq, H*Dh) tensor in q.dtype."""
    B, Lq, H, Dh = q.shape
    Lk = k.shape[1]
    E = H * Dh
    tq = _pick_tile(Lq, tq)
    tk = _pick_tile(Lk, tk)
    vmem_limit = _vmem_limit_bytes()
    hb = h_block if h_block is not None else _pick_h_block(
        H, Dh, tq, tk, budget_bytes=vmem_limit // 4)
    assert H % hb == 0

    grid = (B, H // hb, Lq // tq, Lk // tk)
    kernel = functools.partial(
        _flash_attention_kernel,
        scale=1.0 / math.sqrt(float(Dh)), hb=hb, head_dim=Dh)

    return pl.pallas_call(
        kernel,
        out_shape=jax.ShapeDtypeStruct((B, Lq, E), q.dtype),
        grid=grid,
        in_specs=[
            pl.BlockSpec((1, tq, hb, Dh), lambda b, h, qi, ki: (b, qi, h, 0)),
            pl.BlockSpec((1, tk, hb, Dh), lambda b, h, qi, ki: (b, ki, h, 0)),
            pl.BlockSpec((1, tk, hb, Dh), lambda b, h, qi, ki: (b, ki, h, 0)),
            pl.BlockSpec((tq, tk), lambda b, h, qi, ki: (qi, ki)),  # broadcast mask
        ],
        out_specs=pl.BlockSpec((1, tq, hb * Dh), lambda b, h, qi, ki: (b, qi, h)),
        scratch_shapes=[
            pltpu.VMEM((hb, tq, 1), jnp.float32),   # running max m
            pltpu.VMEM((hb, tq, 1), jnp.float32),   # running sum l
            pltpu.VMEM((hb, tq, Dh), jnp.float32),  # output accumulator
        ],
        compiler_params=pltpu.CompilerParams(
            dimension_semantics=("parallel", "parallel", "parallel", "arbitrary"),
            vmem_limit_bytes=vmem_limit,
        ),
    )(q, k, v, mask)


# ----------------------------------------------------------------------------
# Module: parameters + forward glue (only free reshapes; all matmuls in Pallas).
# ----------------------------------------------------------------------------
class MultiHeadAttentionPallas:
    def __init__(self, heads, embedding_dim, key):
        assert embedding_dim % heads == 0
        self.heads = heads
        self.embedding_dim = embedding_dim
        self.head_samples = embedding_dim // heads

        keys = jax.random.split(key, 8)
        bound = 1.0 / math.sqrt(embedding_dim)  # nn.Linear default init range

        def make_linear(kw_, kb_):
            w = jax.random.uniform(kw_, (embedding_dim, embedding_dim),
                                   minval=-bound, maxval=bound, dtype=jnp.float32)
            b = jax.random.uniform(kb_, (embedding_dim,),
                                   minval=-bound, maxval=bound, dtype=jnp.float32)
            return w, b

        wq, bq = make_linear(keys[0], keys[1])
        wk, bk = make_linear(keys[2], keys[3])
        wv, bv = make_linear(keys[4], keys[5])
        wo, bo = make_linear(keys[6], keys[7])

        # Weights stored bf16 (MXU feed + halved weight HBM traffic); biases f32.
        self.w_qkv = jnp.stack([wq, wk, wv]).astype(jnp.bfloat16)     # (3, E, E)
        self.b_qkv = jnp.stack([bq, bk, bv])[:, None, :]              # (3, 1, E) f32
        self.w_out = wo[None].astype(jnp.bfloat16)                    # (1, E, E)
        self.b_out = bo[None, None, :]                                # (1, 1, E) f32

    def __call__(self, q, k, v, mask):
        # TODO(synk): q/k/v are assumed to share (B, L, E); ragged kv lengths
        # would need separate projection calls.
        batch_size, length, e = q.shape
        H, Dh = self.heads, self.head_samples

        # One batched, tiled Pallas matmul for all three projections (bf16 out).
        x3 = jnp.stack([q.reshape(-1, e), k.reshape(-1, e),
                        v.reshape(-1, e)]).astype(jnp.bfloat16)
        proj = batched_linear(x3, self.w_qkv, self.b_qkv,
                              out_dtype=jnp.bfloat16)                 # (3, B*L, E)

        # Head split is a free reshape; the transpose is folded into the
        # attention kernel's BlockSpecs.
        qh = proj[0].reshape(batch_size, length, H, Dh)
        kh = proj[1].reshape(batch_size, length, H, Dh)
        vh = proj[2].reshape(batch_size, length, H, Dh)

        if mask is None:
            mask2d = jnp.zeros((length, length), jnp.float32)
        else:
            # TODO(synk): per-(batch, head) dense masks are intentionally not
            # streamed from HBM; a shared (Lq, Lk) additive mask is expected.
            mask2d = jnp.asarray(mask, jnp.float32)
            assert mask2d.ndim == 2

        # (B, L, H, Dh) -> lane-dense (B, L, E), heads merged inside the kernel.
        attn = flash_attention(qh, kh, vh, mask2d)                    # bf16

        out = batched_linear(attn.reshape(1, -1, e), self.w_out, self.b_out,
                             out_dtype=jnp.float32)
        return out.reshape(batch_size, length, e)


# ----------------------------------------------------------------------------
# Pure-JAX f32 reference for correctness check
# ----------------------------------------------------------------------------
def reference_forward(mha, q, k, v, mask2d):
    B, L, E = q.shape
    H, Dh = mha.heads, mha.head_samples
    w_qkv = mha.w_qkv.astype(jnp.float32)
    w_out = mha.w_out.astype(jnp.float32)

    def lin(x, w, b):
        return x @ w + b

    qw = lin(q, w_qkv[0], mha.b_qkv[0, 0])
    kw = lin(k, w_qkv[1], mha.b_qkv[1, 0])
    vw = lin(v, w_qkv[2], mha.b_qkv[2, 0])

    def split(x):
        return jnp.transpose(x.reshape(B, L, H, Dh), (0, 2, 1, 3))

    qh, kh, vh = split(qw), split(kw), split(vw)
    scores = jnp.einsum("bhqd,bhkd->bhqk", qh, kh) / jnp.sqrt(jnp.float32(Dh))
    scores = scores + mask2d[None, None] * MASK_SCALE
    weights = jax.nn.softmax(scores, axis=-1)
    attn = jnp.einsum("bhqk,bhkd->bhqd", weights, vh)
    attn = jnp.transpose(attn, (0, 2, 1, 3)).reshape(B, L, E)
    return lin(attn, w_out[0], mha.b_out[0, 0])


if __name__ == "__main__":
    # Small shapes: batch=2, seq length=8, embedding=32, heads=4 (head dim 8).
    B, L, E, H = 2, 8, 32, 4

    key = jax.random.PRNGKey(0)
    k_param, k_q, k_k, k_v = jax.random.split(key, 4)

    mha = MultiHeadAttentionPallas(heads=H, embedding_dim=E, key=k_param)

    q = jax.random.normal(k_q, (B, L, E), dtype=jnp.float32)
    k = jax.random.normal(k_k, (B, L, E), dtype=jnp.float32)
    v = jax.random.normal(k_v, (B, L, E), dtype=jnp.float32)

    # Causal-style additive mask: 1.0 where attention is NOT allowed.
    causal = 1.0 - jnp.tril(jnp.ones((L, L), dtype=jnp.float32))

    out = mha(q, k, v, causal)
    out = jax.block_until_ready(out)

    ref = reference_forward(mha, q, k, v, causal)
    assert out.shape == (B, L, E)
    max_err = float(jnp.max(jnp.abs(out - ref)))
    # bf16 MXU feeds / bf16 intermediates -> compare against f32 reference with
    # a bf16-appropriate tolerance.
    assert jnp.allclose(out, ref, atol=2e-2, rtol=2e-2), (
        f"mismatch vs reference (max abs err {max_err})")

    print("KERNEL_OK")
</pallas_src>

<mosaic_0001>
module attributes {stable_mosaic.version = 11 : i64} {
  func.func @_linear_kernel(%arg0: i32, %arg1: i32, %arg2: i32, %arg3: i32, %arg4: memref<1x16x32xbf16, #tpu.memory_space<vmem>>, %arg5: memref<1x32x32xbf16, #tpu.memory_space<vmem>>, %arg6: memref<1x1x32xf32, #tpu.memory_space<vmem>>, %arg7: memref<1x16x32xbf16, #tpu.memory_space<vmem>>, %arg8: memref<16x32xf32, #tpu.memory_space<vmem>>) attributes {dimension_semantics = [#tpu.dimension_semantics<parallel>, #tpu.dimension_semantics<parallel>, #tpu.dimension_semantics<parallel>, #tpu.dimension_semantics<arbitrary>], iteration_bounds = array<i64: 3, 1, 1, 1>, scalar_prefetch = 0 : i64, scratch_operands = 1 : i64, tpu.core_type = #tpu.core_type<tc>, window_params = [{transform_indices = @transform_0, window_bounds = array<i64: 1, 16, 32>}, {transform_indices = @transform_1, window_bounds = array<i64: 1, 32, 32>}, {transform_indices = @transform_2, window_bounds = array<i64: 1, 1, 32>}, {transform_indices = @transform_3, window_bounds = array<i64: 1, 16, 32>}]} {
    %c0_i32 = arith.constant 0 : i32
    %0 = arith.cmpi eq, %arg3, %c0_i32 : i32
    %1 = arith.extui %0 : i1 to i32
    %c0_i32_0 = arith.constant 0 : i32
    %2 = arith.cmpi ne, %1, %c0_i32_0 : i32
    scf.if %2 {
      %cst_12 = arith.constant 0.000000e+00 : f32
      %14 = vector.broadcast %cst_12 : f32 to vector<16x32xf32>
      %c0_13 = arith.constant 0 : index
      %c0_14 = arith.constant 0 : index
      %15 = vector.load %arg8[%c0_13, %c0_14] : memref<16x32xf32, #tpu.memory_space<vmem>>, vector<16x32xf32>
      tpu.vector_store %arg8[%c0_13, %c0_14], %14 {strides = array<i32>} : memref<16x32xf32, #tpu.memory_space<vmem>>, vector<16x32xf32>,
    } else {
    }
    %c0 = arith.constant 0 : index
    %c0_1 = arith.constant 0 : index
    %3 = vector.load %arg8[%c0, %c0_1] : memref<16x32xf32, #tpu.memory_space<vmem>>, vector<16x32xf32>
    %c0_2 = arith.constant 0 : index
    %c0_3 = arith.constant 0 : index
    %c0_4 = arith.constant 0 : index
    %4 = vector.load %arg4[%c0_2, %c0_3, %c0_4] : memref<1x16x32xbf16, #tpu.memory_space<vmem>>, vector<1x16x32xbf16>
    %5 = vector.shape_cast %4 : vector<1x16x32xbf16> to vector<16x32xbf16>
    %c0_5 = arith.constant 0 : index
    %c0_6 = arith.constant 0 : index
    %c0_7 = arith.constant 0 : index
    %6 = vector.load %arg5[%c0_5, %c0_6, %c0_7] : memref<1x32x32xbf16, #tpu.memory_space<vmem>>, vector<1x32x32xbf16>
    %7 = vector.shape_cast %6 : vector<1x32x32xbf16> to vector<32x32xbf16>
    %cst = arith.constant dense<0.000000e+00> : vector<16x32xf32>
    %8 = tpu.matmul %5, %7, %cst {dimension_numbers = #tpu.dot_dimension_numbers<[1], [0], [0], [1], [0, 0, 1, 1], [], []>} : vector<16x32xbf16>, vector<32x32xbf16>, vector<16x32xf32> -> vector<16x32xf32>
    %9 = arith.addf %3, %8 : vector<16x32xf32>
    %c0_8 = arith.constant 0 : index
    %c0_9 = arith.constant 0 : index
    %10 = vector.load %arg8[%c0_8, %c0_9] : memref<16x32xf32, #tpu.memory_space<vmem>>, vector<16x32xf32>
    tpu.vector_store %arg8[%c0_8, %c0_9], %9 {strides = array<i32>} : memref<16x32xf32, #tpu.memory_space<vmem>>, vector<16x32xf32>,
    %c0_i32_10 = arith.constant 0 : i32
    %11 = arith.cmpi eq, %arg3, %c0_i32_10 : i32
    %12 = arith.extui %11 : i1 to i32
    %c0_i32_11 = arith.constant 0 : i32
    %13 = arith.cmpi ne, %12, %c0_i32_11 : i32
    scf.if %13 {
      %c0_12 = arith.constant 0 : index
      %c0_13 = arith.constant 0 : index
      %14 = vector.load %arg8[%c0_12, %c0_13] : memref<16x32xf32, #tpu.memory_space<vmem>>, vector<16x32xf32>
      %c0_14 = arith.constant 0 : index
      %c0_15 = arith.constant 0 : index
      %c0_16 = arith.constant 0 : index
      %15 = vector.load %arg6[%c0_14, %c0_15, %c0_16] : memref<1x1x32xf32, #tpu.memory_space<vmem>>, vector<1x1x32xf32>
      %16 = vector.shape_cast %15 : vector<1x1x32xf32> to vector<1x32xf32>
      %17 = vector.broadcast %16 : vector<1x32xf32> to vector<16x32xf32>
      %18 = arith.addf %14, %17 : vector<16x32xf32>
      %19 = arith.truncf %18 : vector<16x32xf32> to vector<16x32xbf16>
      %c0_17 = arith.constant 0 : index
      %c0_18 = arith.constant 0 : index
      %c0_19 = arith.constant 0 : index
      %20 = vector.load %arg7[%c0_17, %c0_18, %c0_19] : memref<1x16x32xbf16, #tpu.memory_space<vmem>>, vector<1x16x32xbf16>
      %21 = vector.shape_cast %20 : vector<1x16x32xbf16> to vector<16x32xbf16>
      %22 = vector.shape_cast %19 : vector<16x32xbf16> to vector<1x16x32xbf16>
      tpu.vector_store %arg7[%c0_17, %c0_18, %c0_19], %22 {strides = array<i32>} : memref<1x16x32xbf16, #tpu.memory_space<vmem>>, vector<1x16x32xbf16>,
    } else {
    }
    return
  }
  func.func @transform_0(%arg0: i32, %arg1: i32, %arg2: i32, %arg3: i32) -> (i32, i32, i32) {
    %c0_i32 = arith.constant 0 : i32
    return %arg0, %arg1, %arg3 : i32, i32, i32
  }
  func.func @transform_1(%arg0: i32, %arg1: i32, %arg2: i32, %arg3: i32) -> (i32, i32, i32) {
    %c0_i32 = arith.constant 0 : i32
    return %arg0, %arg3, %arg2 : i32, i32, i32
  }
  func.func @transform_2(%arg0: i32, %arg1: i32, %arg2: i32, %arg3: i32) -> (i32, i32, i32) {
    %c0_i32 = arith.constant 0 : i32
    %c0_i32_0 = arith.constant 0 : i32
    return %arg0, %c0_i32, %arg2 : i32, i32, i32
  }
  func.func @transform_3(%arg0: i32, %arg1: i32, %arg2: i32, %arg3: i32) -> (i32, i32, i32) {
    %c0_i32 = arith.constant 0 : i32
    return %arg0, %arg1, %arg2 : i32, i32, i32
  }
}

</mosaic_0001>

<bundles_post_ra>
// kernel: tpu_custom_call.1
= control target key start
LH: loop header
LB: loop body
LE: loop exit
PB: predicated region body
PF: predicated region fallthrough
CT: control target
= control target key end

     0   :  { %8 = vsyncpa [#allocation4], 0  ;;  %s1097_s0 = inlined_call_operand.hbm [shape: bf16[3,16,32], index: 0, kind: input, shape index: {}]   ;;  %s1098_s1 = inlined_call_operand.hbm [shape: bf16[3,32,32], index: 1, kind: input, shape index: {}]   ;;  %s1099_s2 = inlined_call_operand.vmem [shape: f32[3,1,32], index: 2, kind: input, shape index: {}]   ;;  %s1100_s3 = inlined_call_operand.hbm [shape: bf16[3,16,32], index: 3, kind: output, shape index: {}]  }
   0x1   :  { %10 = vsyncpa [#allocation4 + $0x1], 0 }
   0x2   :  { %11 = vsyncpa [#allocation7], 0 }
   0x3   :  { %13 = vsyncpa [#allocation7 + $0x1], 0 }
   0x4   :  { %14 = vsyncpa [#allocation5], 0 }
   0x5   :  { %16 = vsyncpa [#allocation5 + $0x1], 0  ;;  %s854_s12 = smov 0   ;;  %s856_s13 = smov 0  }
   0x6   :  { %s858_s14 = smov 0   ;;  %s860_s15 = smov 0  }
   0x7   :  { %s862_s16 = smov 0   ;;  %s864_s17 = smov 0  }
   0x8 LB: > { %s559_s18 = sadd.s32 4294967295, %s823_s17   ;;  %s560_s19 = sadd.s32 4294967294, %s823_s17   ;;  %s823_s17 = sphi %s864_s17, %s22_s17   ;;  %s819_s16 = sphi %s862_s16, %s1117_s16   ;;  %s815_s15 = sphi %s860_s15, %s1116_s15   ;;  %s811_s14 = sphi %s858_s14, %s1115_s14   ;;  %s807_s13 = sphi %s856_s13, %s1114_s13   ;;  %s803_s12 = sphi %s854_s12, %s1113_s12  }
   0x9   : > { %s48_s20 = sadd.s32 1, %s819_s16  ;;  %s59_s21 = sadd.s32 1, %s811_s14 }
   0xa   : > { %p50_p0 = scmp.ge.s32.totalorder %s48_s20, 3  ;;  %p66_p1 = scmp.ne.s32.totalorder %s811_s14, %s807_s13 }
   0xb   : > { %p67_p2 = scmp.eq.s32.totalorder %s823_s17, 0  ;;  %p72_p3 = scmp.ne.s32.totalorder %s807_s13, %s803_s12 }
   0xc   : > { %s1119_s20 = smov (%p50_p0, %s48_s20), 0  ;;  %p73_p5 = scmp.eq.s32.totalorder %s559_s18, 0 }
   0xd   : > { %p895_p4 = por %p67_p2, %p66_p1  ;;  %s52_s23 = ssub.s32 %s819_s16, %s1119_s20 }
   0xe   : > { %p158_p6 = scmp.eq.s32.totalorder %s559_s18, 2  ;;  %p57_p7 = scmp.eq.s32.totalorder %s52_s23, 0 }
   0xf   : > { %p901_p8 = por %p73_p5, %p72_p3  ;;  %p164_p10 = scmp.eq.s32.totalorder %s560_s19, 2 }
  0x10   : > { %p905_p9 = por %p158_p6, %p66_p1  ;;  %p618_p12 = scmp.lt.s32.totalorder %s823_s17, 3 }
  0x11   : > { %s1104_s24 = scalar_select %p901_p8, 1, 0 }
  0x12   : > { %s1105_s25 = scalar_select %p905_p9, 1, 0 }
  0x13   : > { %s910_s26 = scalar_select %p57_p7, %s811_s14, %s59_s21  }
  0x14   : > { %p912_p11 = por %p164_p10, %p72_p3  ;;  %s918_s28 = sand.u32 1, %s811_s14  }
  0x15   : > { %s563_s29 = sshll.u32 %s918_s28, 3  ;;  %s585_s30 = sshll.u32 %s819_s16, 7 }
  0x16   : > { %s1106_s27 = scalar_select %p912_p11, 1, 0 }
  0x17   : > { %s925_s6 = scalar_lea.hbm %s1097_s0, %s585_s30  ;;  %s188_s7 = scalar_lea.vmem [#allocation3], %s563_s29 }
  0x18   : > { %s198_s8 = sshll.u32 %s188_s7, 4  ;;  %p931_p13 = pnand %p618_p12, %p895_p4  ;;  %s927_s8 = int_to_ptr.vmem [resolvable:$true] %s198_s8 }
  0x19   : > { %s185_s10 = scalar_lea.sflag [#allocation4], %s918_s28  ;;  %s677_s11 = scalar_lea.hbm %s925_s6, 128 }
  0x1a   : > { %p678_p1 = scmp.ne.s32.totalorder %s925_s6, %s677_s11  ;;  %p679_p2 = pneg %p931_p13 }
  0x1b   : > { %s682_s21 = scalar_lea.hbm %s1097_s0, 384  ;;  %p683_p4 = scmp.lt.u32.totalorder %s925_s6, %s1097_s0 }
  0x1c   : > { %p680_p3 = pnand %p679_p2, %p678_p1  ;;  %p684_p6 = scmp.lt.u32.totalorder %s682_s21, %s677_s11 }
  0x1d   : > { %p686_p10 = scmp.lt.u32.totalorder %s677_s11, %s925_s6 }
  0x1e   : > { %p681_p5 = pneg %p680_p3  ;;  %p685_p7 = por %p684_p6, %p683_p4 }
  0x20   : > { %p687_p12 = por %p686_p10, %p685_p7 }
  0x22   : > { %p688_p0 = pnand %p687_p12, %p681_p5 }
  0x24   : > { %691 = shalt.err (!%p688_p0)
}
  0x25   : > { %s692_s29 = scalar_lea.vmem %s927_s8, 128  ;;  %s825_s30 = smov [#allocation3]  }
  0x26   : > { %p693_p1 = scmp.ne.s32.totalorder %s927_s8, %s692_s29  ;;  %s697_s4 = sshll.u32 %s825_s30, 4  ;;  %s698_s4 = int_to_ptr.vmem [resolvable:$false] %s697_s4 }
  0x27   : > { %s699_s5 = scalar_lea.vmem %s698_s4, 256  ;;  %p700_p9 = scmp.lt.s32.totalorder %s927_s8, %s698_s4 }
  0x28   : > { %p695_p3 = pnand %p693_p1, %p679_p2  ;;  %p701_p4 = scmp.lt.s32.totalorder %s699_s5, %s692_s29 }
  0x2a   : > { %p696_p11 = pneg %p695_p3  ;;  %p702_p6 = por %p701_p4, %p700_p9 }
  0x2c   : > { %p703_p7 = pnand %p702_p6, %p696_p11 }
  0x2e   : > { %706 = shalt.err (!%p703_p7)
}
  0x2f   : > { %s826_s7 = smov 64   ;;  %s827_s11 = smov 4  }
  0x30   : > { %610 = dma.hbm_to_vmem [thread:$0]  (!%p931_p13), %s925_s6, 128, %s927_s8, %s185_s10, %s826_s7, %s826_s7, %s827_s11  }
  0x31   : > { %p239_p9 = scmp.lt.s32.totalorder %s823_s17, 4  ;;  %s566_s18 = sshll.u32 %s918_s28, 4 }
  0x32   : > { %s586_s19 = sshll.u32 %s819_s16, 8  ;;  %p1108_p11 = scmp.ge.s32.totalorder %s823_s17, 1 }
  0x33   : > { %s979_s29 = scalar_lea.hbm %s1098_s1, %s586_s19  ;;  %s212_s30 = scalar_lea.vmem [#allocation6], %s566_s18 }
  0x34   : > { %p972_p0 = pnand %p1108_p11, %p239_p9  ;;  %s222_s4 = sshll.u32 %s212_s30, 4  ;;  %s981_s4 = int_to_ptr.vmem [resolvable:$true] %s222_s4 }
  0x35   : > { %s209_s6 = scalar_lea.sflag [#allocation7], %s918_s28  ;;  %s707_s8 = scalar_lea.hbm %s979_s29, 256 }
  0x36   : > { %p708_p5 = scmp.ne.s32.totalorder %s979_s29, %s707_s8  ;;  %s712_s19 = scalar_lea.hbm %s1098_s1, 768 }
  0x37   : > { %p713_p1 = scmp.lt.u32.totalorder %s979_s29, %s1098_s1  ;;  %p714_p3 = scmp.lt.u32.totalorder %s712_s19, %s707_s8 }
  0x38   : > { %p710_p10 = pnand %p708_p5, %p679_p2  ;;  %p716_p6 = scmp.lt.u32.totalorder %s707_s8, %s979_s29 }
  0x39   : > { %p715_p4 = por %p714_p3, %p713_p1 }
  0x3a   : > { %p711_p12 = pneg %p710_p10 }
  0x3b   : > { %p717_p7 = por %p716_p6, %p715_p4 }
  0x3d   : > { %p718_p9 = pnand %p717_p7, %p711_p12 }
  0x3f   : > { %721 = shalt.err (!%p718_p9)
}
  0x40   : > { %s722_s18 = scalar_lea.vmem %s981_s4, 256  ;;  %s828_s30 = smov [#allocation6]  }
  0x41   : > { %p723_p11 = scmp.ne.s32.totalorder %s981_s4, %s722_s18  ;;  %s727_s10 = sshll.u32 %s828_s30, 4  ;;  %s728_s10 = int_to_ptr.vmem [resolvable:$false] %s727_s10 }
  0x42   : > { %s729_s5 = scalar_lea.vmem %s728_s10, 512  ;;  %p730_p8 = scmp.lt.s32.totalorder %s981_s4, %s728_s10 }
  0x43   : > { %p725_p5 = pnand %p723_p11, %p679_p2  ;;  %p731_p1 = scmp.lt.s32.totalorder %s729_s5, %s722_s18 }
  0x45   : > { %p726_p10 = pneg %p725_p5  ;;  %p732_p3 = por %p731_p1, %p730_p8 }
  0x47   : > { %p733_p4 = pnand %p732_p3, %p726_p10 }
  0x49   : > { %736 = shalt.err (!%p733_p4)
}
  0x4a   : > { %613 = dma.hbm_to_vmem [thread:$0]  (!%p931_p13), %s979_s29, 256, %s981_s4, %s209_s6, %s826_s7, %s826_s7, %s827_s11  }
  0x4b   : > { %243 = sbr.rel (%p972_p0) target bundleno = 338 (0x152), region = 32  ;;  %s1015_s8 = sand.u32 (!%p972_p0), 1, %s807_s13  }
  0x4c   : > { %s570_s19 = sshll.u32 (!%p972_p0), %s1015_s8, 3  ;;  %s246_s9 = scalar_lea.sflag (!%p972_p0), [#allocation4], %s1015_s8 }
  0x4d   : > { %s249_s22 = scalar_lea.vmem (!%p972_p0), [#allocation3], %s570_s19  ;;  %p1110_p8 = scmp.ne.s32.totalorder (!%p972_p0), %s1104_s24, 0 }
  0x52   : > { %790 = dma.done.wait (%p1110_p8), %s246_s9, 128  }
  0x53   : > { %792 = vsyncadd (%p1110_p8), %s246_s9, 4294967168  ;;  %s571_s28 = sshll.u32 %s1015_s8, 4  ;;  %s255_s7 = scalar_lea.sflag [#allocation7], %s1015_s8 }
  0x54   : > { %s258_s11 = scalar_lea.vmem [#allocation6], %s571_s28 }
  0x55   : > { %794 = dma.done.wait (%p1110_p8), %s255_s7, 256  }
  0x56   : > { %796 = vsyncadd (%p1110_p8), %s255_s7, 4294967040  ;;  %vm306_vm0 = vcmask 261120   ;;  %v829_v0 = vmov 0.0   ;;  %vm830_vm1 = vmmov 0   ;;  %v674_v1 = vld [vmem:[%s258_s11] sm:$0xff]   ;;  %v675_v2 = vld [vmem:[%s258_s11 + $0x8] sm:$0xff]  }
  0x57   : > { %593 = vmatprep.subr.bf16.mxu0 %v829_v0  ;;  %597 = vmatprep.mubr.msk.bf16.mxu0 %vm830_vm1, %v829_v0  ;;  %307 = vst.msk [vmem:[#allocation2] sm:$0xff] %vm306_vm0, %v829_v0  ;;  %308 = vst.msk [vmem:[#allocation2 + $0x8] sm:$0xff] %vm306_vm0, %v829_v0  ;;  %v676_v3 = vld [vmem:[%s249_s22] sm:$0xff]   ;;  %p294_p13 = scmp.lt.s32.totalorder %s815_s15, 2  ;;  %s589_s6 = sshll.u32 %s815_s15, 7  ;;  %vm405_vm2 = vcmask 257024  }
  0x58   : > { %594 = vmatpush3.bf16.msra.mxu0 %v674_v1  ;;  %s291_s23 = scalar_lea.vmem [#allocation8], %s570_s19  ;;  %s1047_s5 = scalar_lea.hbm %s1100_s3, %s589_s6 }
  0x59   : > { %595 = vmatprep.subr.bf16.mxu0 %v829_v0  ;;  %s295_s24 = scalar_select %p294_p13, %s815_s15, 2 }
  0x5a   : > { %s425_s18 = sshll.u32 %s291_s23, 4  ;;  %s409_s15 = scalar_lea.sflag [#allocation5], %s1015_s8  ;;  %s1049_s18 = int_to_ptr.vmem [resolvable:$true] %s425_s18 }
  0x5b   : > { %s299_s4 = scalar_lea.vmem %s1099_s2, %s295_s24  ;;  %s737_s19 = scalar_lea.vmem %s1049_s18, 128 }
  0x5c   : > { %596 = vmatpush3.bf16.msra.mxu0 %v675_v2  ;;  %v577_v12 = vld [vmem:[%s299_s4] ss:$0 sm:$0xff]  ;;  %p738_p2 = scmp.ne.s32.totalorder %s1049_s18, %s737_s19  ;;  %p1111_p0 = scmp.ne.s32.totalorder %s1105_s25, 0 }
  0x5d   : > { %s831_s9 = smov [#allocation8]  }
  0x5e   : > { %v309_v4 = vld [vmem:[#allocation2] sm:$0xff]  ;;  %v310_v6 = vld [vmem:[#allocation2 + $0x8] sm:$0xff]  ;;  %p739_p12 = pnand %p738_p2, %p1111_p0  ;;  %s741_s22 = sshll.u32 %s831_s9, 4  ;;  %s742_s22 = int_to_ptr.vmem [resolvable:$false] %s741_s22 }
  0x5f   : > { %598 = vmatmul.mubr.msk.bf16.vlgmr.msra.gmra.mrb[0].mxu0 %vm306_vm0, %v676_v3  ;;  %s743_s28 = scalar_lea.vmem %s742_s22, 256  ;;  %p744_p7 = scmp.lt.s32.totalorder %s1049_s18, %s742_s22 }
  0x60   : > { %p740_p6 = pneg %p739_p12  ;;  %p745_p9 = scmp.lt.s32.totalorder %s743_s28, %s737_s19 }
  0x62   : > { %p746_p11 = por %p745_p9, %p744_p7 }
  0x64   : > { %p747_p5 = pnand %p746_p11, %p740_p6 }
 0x132   : > { %v372_v5 = vpop.f32.mrb[0].mxu0 }
 0x133   : > { %v379_v7 = vadd.f32 %v372_v5, %v309_v4  ;;  %v599_v8 = vpop.f32.mrb[1].mxu0 }
 0x134   : > { %v375_v9 = vpop.f32.mrb[2].mxu0 }
 0x135   : > { %381 = vst.msk [vmem:[#allocation2] sm:$0xff] %vm306_vm0, %v379_v7  ;;  %v380_v10 = vadd.f32 %v375_v9, %v310_v6  ;;  %v600_v11 = vpop.f32.mrb[3].mxu0 }
 0x137   : > { %382 = vst.msk [vmem:[#allocation2 + $0x8] sm:$0xff] %vm306_vm0, %v380_v10 }
 0x13c   : > { %v386_v13 = vld [vmem:[#allocation2] sm:$0xff] }
 0x13d   : > { %v395_v14 = vadd.f32 %v577_v12, %v386_v13 }
 0x13e   : > { %v387_v15 = vld [vmem:[#allocation2 + $0x8] sm:$0xff] }
 0x13f   : > { %v396_v16 = vadd.f32 %v577_v12, %v387_v15  ;;  %v587_v17 = vpack.c.bf16 %v395_v14, %v395_v14 }
 0x141   : > { %v588_v18 = vpack.c.bf16 %v396_v16, %v396_v16  ;;  %406 = vst.msk [vmem:[%s291_s23] sm:$0xf] %vm405_vm2, %v587_v17 }
 0x143   : > { %407 = vst.msk [vmem:[%s291_s23 + $0x4] sm:$0xf] %vm405_vm2, %v588_v18 }
 0x144   : > { %750 = shalt.err (!%p747_p5)
}
 0x145   : > { %s751_s7 = scalar_lea.hbm %s1047_s5, 128  ;;  %s755_s21 = scalar_lea.hbm %s1100_s3, 384 }
 0x146   : > { %p752_p10 = scmp.ne.s32.totalorder %s1047_s5, %s751_s7  ;;  %p756_p4 = scmp.lt.u32.totalorder %s1047_s5, %s1100_s3 }
 0x147   : > { %p757_p8 = scmp.lt.u32.totalorder %s755_s21, %s751_s7  ;;  %p759_p2 = scmp.lt.u32.totalorder %s751_s7, %s1047_s5 }
 0x148   : > { %p753_p1 = pnand %p752_p10, %p1111_p0 }
 0x149   : > { %p758_p13 = por %p757_p8, %p756_p4 }
 0x14a   : > { %p754_p3 = pneg %p753_p1 }
 0x14b   : > { %p760_p12 = por %p759_p2, %p758_p13 }
 0x14d   : > { %p761_p6 = pnand %p760_p12, %p754_p3 }
 0x14f   : > { %764 = shalt.err (!%p761_p6)
}
 0x150   : > { %s832_s6 = smov 64   ;;  %s833_s23 = smov 4  }
 0x151   : > { %605 = dma.vmem_to_hbm [thread:$0]  (%p1111_p0), %s1049_s18, 128, %s1047_s5, %s409_s15, %s832_s6, %s832_s6, %s833_s23  }
 0x152 PF: > { %p619_p7 = scmp.ge.s32.totalorder %s823_s17, 2  ;;  %s440_s30 = sand.u32 1, %s803_s12  }
 0x153   : > { %p1112_p9 = scmp.ne.s32.totalorder %s1106_s27, 0  ;;  %s441_s10 = scalar_lea.sflag [#allocation5], %s440_s30 }
 0x155   : > { %p615_p11 = pnand %p619_p7, %p1112_p9 }
 0x157   : > { %798 = dma.done.wait (!%p615_p11), %s441_s10, 128  }
 0x158   : > { %800 = vsyncadd (!%p615_p11), %s441_s10, 4294967168  ;;  %s22_s17 = sadd.s32 1, %s823_s17   ;;  %s1113_s12 = smov %s807_s13 }
 0x159   : > { %p19_p5 = scmp.ge.s32.totalorder %s22_s17, 5   ;;  %s1114_s13 = smov %s811_s14 }
 0x15a   : > { %s1115_s14 = smov %s910_s26  ;;  %s1116_s15 = smov %s819_s16 }
 0x15b   : > { %s1117_s16 = smov %s1119_s20  ;;  %21 = sbr.rel (!%p19_p5) target bundleno = 8 (0x8), region = 101 }
 0x162   :  { %446 = vsyncpa [#allocation4], 1 }
 0x163   :  { %448 = vsyncpa [#allocation4 + $0x1], 1 }
 0x164   :  { %449 = vsyncpa [#allocation7], 1 }
 0x165   :  { %451 = vsyncpa [#allocation7 + $0x1], 1 }
 0x166   :  { %452 = vsyncpa [#allocation5], 1 }
 0x167   :  { %454 = vsyncpa [#allocation5 + $0x1], 1 }

</bundles_post_ra>
